<compile_context>
chip_gen: v5e
topology: v5e:2x2
jax: 0.10.0
libtpu: 0.0.40
codegen_flags: <defaults>
</compile_context>

<pallas_src>
import functools

import jax
import jax.numpy as jnp
from jax import lax
from jax.experimental import pallas as pl
from jax.experimental.pallas import tpu as pltpu
from jax.scipy.special import logsumexp


def _round_up(x, m):
    return ((x + m - 1) // m) * m


def bigram_kernel(tok_ref, fused_ref, logits_ref, nll_ref, *, n_valid):
    """One grid step: gather logits rows + fused cross-entropy partial sum.

    tok_ref:    (tn, 2)     int32   column 0 = token id, column 1 = target id
    fused_ref:  (VP, VP2)   float32 [:, :VP] = emb @ W^T + b (pad cols = -1e30),
                                    [:, VP]  = logsumexp of the row, rest 0
    logits_ref: (tn, VP)    logits dtype (f32 or bf16)
    nll_ref:    (1, 1, 128) float32 lane 0 = per-tile partial sum of NLL
    """
    i = pl.program_id(0)
    tn, VP = logits_ref.shape
    VP2 = fused_ref.shape[1]

    tok = tok_ref[...]
    idx = tok[:, 0:1]                                           # (tn, 1)
    tgt = tok[:, 1:2]                                           # (tn, 1)

    # One-hot row gather from the fused bigram table on the MXU (K = VP).
    colk = lax.broadcasted_iota(jnp.int32, (tn, VP), 1)
    onehot = (colk == idx).astype(jnp.float32)
    res = jnp.dot(onehot, fused_ref[...],
                  preferred_element_type=jnp.float32)           # (tn, VP2)

    # Lane-dense logits writeback (bias already folded into the table).
    logits_ref[...] = res[:, :VP].astype(logits_ref.dtype)

    # Cross entropy: nll = lse[idx] - logits[idx, tgt]; the lse column was
    # precomputed in the wrapper, so no max/exp/log is needed in-kernel.
    coln = lax.broadcasted_iota(jnp.int32, (tn, VP2), 1)
    contrib = jnp.where(coln == VP, res,
                        jnp.where(coln == tgt, -res, 0.0))
    nll_row = jnp.sum(contrib, axis=-1, keepdims=True)          # (tn, 1)

    # Mask padded token rows and reduce to one scalar per grid step.
    row = i * tn + lax.broadcasted_iota(jnp.int32, (tn, 1), 0)
    partial = jnp.sum(jnp.where(row < n_valid, nll_row, 0.0))

    lane = lax.broadcasted_iota(jnp.int32, nll_ref.shape, 2)
    nll_ref[...] = jnp.where(lane == 0, partial, 0.0)


def bigram_forward(idx, targets, emb_table, w_head, b_head, *,
                   block_rows=4096, logits_dtype=jnp.float32):
    """Forward pass of BigramLanguageModelv2 (eval-mode dropout).

    idx, targets: (B, T) integer token ids (targets may be None).
    emb_table: (V, E); w_head: (V, E); b_head: (V,).
    block_rows: token-tile size; prefer 2K-8K (multiple of 128) at real sizes,
      clamped/rounded for tiny inputs.
    logits_dtype: jnp.float32 (exact) or jnp.bfloat16 (halves logits HBM
      writeback; CE/loss math stays f32 in-kernel).
    """
    B, T = idx.shape
    V, E = emb_table.shape
    N = B * T
    itemsize = jnp.dtype(logits_dtype).itemsize
    sub = 8 if itemsize >= 4 else 16                  # sublane granule

    VP = _round_up(V, 128)                            # lane-dense padded vocab
    VP2 = VP + 128                                    # + one block for the lse column

    # Token tile: prefer large multiples of 128; avoid row padding when a
    # single tile already covers all tokens.
    if block_rows >= N:
        tn = _round_up(N, sub)
    else:
        tn = _round_up(max(block_rows, 128), 128)
        if tn >= N:
            tn = _round_up(N, sub)
    N_pad = _round_up(N, tn)
    G = N_pad // tn

    # Fused bigram table (bias folded in) + per-vocab logsumexp column.
    emb = emb_table.astype(jnp.float32)
    w = w_head.astype(jnp.float32)
    b = b_head.astype(jnp.float32)
    fused = jnp.dot(emb, w.T, precision=lax.Precision.HIGHEST) + b[None, :]   # (V, V)
    lse_col = logsumexp(fused, axis=-1)                                       # (V,)
    fused_p = jnp.zeros((VP, VP2), jnp.float32)
    if VP != V:
        fused_p = fused_p.at[:V, V:VP].set(-1e30)     # padded vocab columns
    fused_p = fused_p.at[:V, :V].set(fused)
    fused_p = fused_p.at[:V, VP].set(lse_col)

    # Pack idx / targets into one (N_pad, 2) operand (one small DMA per step).
    tgt = targets if targets is not None else jnp.zeros_like(idx)
    tok = jnp.zeros((N_pad, 2), jnp.int32)
    tok = tok.at[:N, 0].set(idx.reshape(N).astype(jnp.int32))
    tok = tok.at[:N, 1].set(tgt.reshape(N).astype(jnp.int32))

    # VMEM budget: ~75% of physical VMEM (~48 MiB on v7x, ~96 MiB on v5e/v6e).
    try:
        phys_vmem = int(pltpu.get_tpu_info().vmem_capacity_bytes)
    except Exception:
        phys_vmem = 64 * 1024 * 1024                  # conservative: v7x per-TC VMEM
    vmem_cap = (phys_vmem * 3) // 4
    vmem_need = (4 * VP * VP2                               # resident fused table (1 buffer)
                 + 2 * tn * (2 * 4 + VP * itemsize + 4)     # double-buffered tok + logits
                 + 4 * tn * (VP + VP2)                      # onehot / matmul-result temporaries
                 + 2 * 128 * 4                              # per-tile NLL partial blocks
                 + (4 << 20))                               # compiler scratch headroom
    vmem_limit = int(min(max(vmem_need, 4 << 20), vmem_cap))

    cost = pl.CostEstimate(
        flops=int(2 * N_pad * VP * VP2 + 8 * N_pad * VP2),
        transcendentals=0,
        bytes_accessed=int(4 * VP * VP2 + N_pad * (2 * 4 + VP * itemsize) + G * 128 * 4),
    )

    kernel = functools.partial(bigram_kernel, n_valid=N)

    def build_call(fused_spec):
        grid_spec = pltpu.PrefetchScalarGridSpec(
            num_scalar_prefetch=0,
            grid=(G,),
            in_specs=[
                pl.BlockSpec((tn, 2), lambda i: (i, 0)),           # packed idx/target tile
                fused_spec,                                        # fused table (resident)
            ],
            out_specs=(
                pl.BlockSpec((tn, VP), lambda i: (i, 0)),          # logits tile
                pl.BlockSpec((1, 1, 128), lambda i: (i, 0, 0)),    # per-tile NLL partial
            ),
        )
        return pl.pallas_call(
            kernel,
            out_shape=(
                jax.ShapeDtypeStruct((N_pad, VP), logits_dtype),
                jax.ShapeDtypeStruct((G, 1, 128), jnp.float32),
            ),
            grid_spec=grid_spec,
            compiler_params=pltpu.CompilerParams(
                dimension_semantics=("parallel",),
                vmem_limit_bytes=vmem_limit,
            ),
            cost_estimate=cost,
        )

    # Prefer whole-array VMEM residency (single buffer, copied in once); fall
    # back to a constant-index resident block if the former is unsupported.
    fused_spec_candidates = (
        pl.BlockSpec(memory_space=pltpu.MemorySpace.VMEM),
        pl.BlockSpec((VP, VP2), lambda i: (0, 0)),
    )
    err = None
    for fused_spec in fused_spec_candidates:
        try:
            logits_pad, nll = build_call(fused_spec)(tok, fused_p)
            err = None
            break
        except Exception as e:                        # pragma: no cover
            err = e
    if err is not None:
        raise err

    # Slice padding off only when it exists (avoids an extra HBM copy otherwise).
    logits = logits_pad
    if N_pad != N or VP != V:
        logits = logits_pad[:N, :V]

    if targets is None:
        return logits.reshape(B, T, V), None
    loss = jnp.sum(nll) / N                           # padded rows contribute 0
    return logits, loss


def reference_forward(idx, targets, emb_table, w_head, b_head):
    """Pure-JAX reference matching the torch module (eval-mode dropout)."""
    B, T = idx.shape
    V, E = emb_table.shape
    token_emb = emb_table[idx]                                   # (B, T, E)
    logits = jnp.dot(token_emb, w_head.T,
                     precision=lax.Precision.HIGHEST) + b_head
    logits = logits.reshape(B * T, V)
    tgt = targets.reshape(B * T)
    lse = logsumexp(logits, axis=-1)
    picked = jnp.take_along_axis(logits, tgt[:, None], axis=-1)[:, 0]
    loss = jnp.mean(lse - picked)
    return logits, loss


if __name__ == "__main__":
    # Deterministic setup consistent with the module (char-level bigram LM).
    vocab_size = 65       # e.g. tiny-shakespeare character vocab
    emb_dim = 32

    key = jax.random.PRNGKey(0)
    k_emb, k_w, k_b, k_idx, k_tgt = jax.random.split(key, 5)

    emb_table = jax.random.normal(k_emb, (vocab_size, emb_dim), jnp.float32) * 0.02
    w_head = jax.random.normal(k_w, (vocab_size, emb_dim), jnp.float32) * 0.02
    b_head = jax.random.normal(k_b, (vocab_size,), jnp.float32) * 0.02

    # Case 1: small (B=2, T=8), single token tile, exact f32 logits.
    B, T = 2, 8
    idx = jax.random.randint(k_idx, (B, T), 0, vocab_size, jnp.int32)
    targets = jax.random.randint(k_tgt, (B, T), 0, vocab_size, jnp.int32)
    logits, loss = bigram_forward(idx, targets, emb_table, w_head, b_head)
    logits = jax.block_until_ready(logits)
    loss = jax.block_until_ready(loss)
    ref_logits, ref_loss = reference_forward(idx, targets, emb_table, w_head, b_head)
    assert jnp.allclose(logits, ref_logits, atol=1e-5, rtol=1e-5)
    assert jnp.allclose(loss, ref_loss, atol=1e-5, rtol=1e-5)

    # Case 2: multi-tile grid with row padding/masking (N=240, tn=128, G=2).
    B2, T2 = 4, 60
    k_idx2, k_tgt2 = jax.random.split(jax.random.PRNGKey(1), 2)
    idx2 = jax.random.randint(k_idx2, (B2, T2), 0, vocab_size, jnp.int32)
    targets2 = jax.random.randint(k_tgt2, (B2, T2), 0, vocab_size, jnp.int32)
    logits2, loss2 = bigram_forward(idx2, targets2, emb_table, w_head, b_head,
                                    block_rows=128)
    logits2 = jax.block_until_ready(logits2)
    ref_logits2, ref_loss2 = reference_forward(idx2, targets2, emb_table, w_head, b_head)
    assert jnp.allclose(logits2, ref_logits2, atol=1e-5, rtol=1e-5)
    assert jnp.allclose(loss2, ref_loss2, atol=1e-5, rtol=1e-5)

    # Case 3: bf16 logits writeback (CE/loss math stays f32 in-kernel).
    logits3, loss3 = bigram_forward(idx, targets, emb_table, w_head, b_head,
                                    logits_dtype=jnp.bfloat16)
    loss3 = jax.block_until_ready(loss3)
    assert jnp.allclose(loss3, ref_loss, atol=1e-5, rtol=1e-5)
    assert jnp.allclose(logits3.astype(jnp.float32), ref_logits, atol=1e-2, rtol=1e-2)

    print("KERNEL_OK")
</pallas_src>

<mosaic_0001>
module attributes {stable_mosaic.version = 11 : i64} {
  func.func @bigram_kernel(%arg0: i32, %arg1: memref<16x2xi32, #tpu.memory_space<vmem>>, %arg2: memref<128x256xf32, #tpu.memory_space<vmem>>, %arg3: memref<16x128xf32, #tpu.memory_space<vmem>>, %arg4: memref<1x1x128xf32, #tpu.memory_space<vmem>>) attributes {dimension_semantics = [#tpu.dimension_semantics<parallel>], iteration_bounds = array<i64: 1>, scalar_prefetch = 0 : i64, scratch_operands = 0 : i64, tpu.core_type = #tpu.core_type<tc>, window_params = [{transform_indices = @transform_0, window_bounds = array<i64: 16, 2>}, {pipeline_mode = #tpu.pipeline_mode<synchronous>, transform_indices = @transform_1, window_bounds = array<i64: 128, 256>}, {transform_indices = @transform_2, window_bounds = array<i64: 16, 128>}, {transform_indices = @transform_3, window_bounds = array<i64: 1, 1, 128>}]} {
    %c0 = arith.constant 0 : index
    %c0_0 = arith.constant 0 : index
    %0 = vector.load %arg1[%c0, %c0_0] : memref<16x2xi32, #tpu.memory_space<vmem>>, vector<16x2xi32>
    %1 = vector.extract_strided_slice %0 {offsets = [0, 0], sizes = [16, 1], strides = [1, 1]} : vector<16x2xi32> to vector<16x1xi32>
    %2 = vector.extract_strided_slice %0 {offsets = [0, 1], sizes = [16, 1], strides = [1, 1]} : vector<16x2xi32> to vector<16x1xi32>
    %3 = tpu.iota {dimensions = array<i32: 1>} : vector<16x128xi32>
    %4 = vector.broadcast %1 : vector<16x1xi32> to vector<16x128xi32>
    %5 = arith.cmpi eq, %3, %4 : vector<16x128xi32>
    %6 = arith.extui %5 : vector<16x128xi1> to vector<16x128xi32>
    %7 = arith.sitofp %6 : vector<16x128xi32> to vector<16x128xf32>
    %c0_1 = arith.constant 0 : index
    %c0_2 = arith.constant 0 : index
    %8 = vector.load %arg2[%c0_1, %c0_2] : memref<128x256xf32, #tpu.memory_space<vmem>>, vector<128x256xf32>
    %cst = arith.constant dense<0.000000e+00> : vector<16x256xf32>
    %9 = tpu.matmul %7, %8, %cst {dimension_numbers = #tpu.dot_dimension_numbers<[1], [0], [0], [1], [0, 0, 1, 1], [], []>} : vector<16x128xf32>, vector<128x256xf32>, vector<16x256xf32> -> vector<16x256xf32>
    %10 = vector.extract_strided_slice %9 {offsets = [0, 0], sizes = [16, 128], strides = [1, 1]} : vector<16x256xf32> to vector<16x128xf32>
    %c0_3 = arith.constant 0 : index
    %c0_4 = arith.constant 0 : index
    %11 = vector.load %arg3[%c0_3, %c0_4] : memref<16x128xf32, #tpu.memory_space<vmem>>, vector<16x128xf32>
    tpu.vector_store %arg3[%c0_3, %c0_4], %10 {strides = array<i32>} : memref<16x128xf32, #tpu.memory_space<vmem>>, vector<16x128xf32>,
    %12 = tpu.iota {dimensions = array<i32: 1>} : vector<16x256xi32>
    %c128_i32 = arith.constant 128 : i32
    %13 = vector.broadcast %c128_i32 : i32 to vector<16x256xi32>
    %14 = arith.cmpi eq, %12, %13 : vector<16x256xi32>
    %15 = vector.broadcast %2 : vector<16x1xi32> to vector<16x256xi32>
    %16 = arith.cmpi eq, %12, %15 : vector<16x256xi32>
    %cst_5 = arith.constant 0.000000e+00 : f32
    %17 = vector.broadcast %cst_5 : f32 to vector<16x256xf32>
    %18 = arith.subf %17, %9 : vector<16x256xf32>
    %cst_6 = arith.constant 0.000000e+00 : f32
    %19 = vector.broadcast %cst_6 : f32 to vector<16x256xf32>
    %20 = arith.select %16, %18, %19 : vector<16x256xi1>, vector<16x256xf32>
    %21 = arith.select %14, %9, %20 : vector<16x256xi1>, vector<16x256xf32>
    %cst_7 = arith.constant dense<0.000000e+00> : vector<16xf32>
    %22 = vector.multi_reduction <add>, %21, %cst_7 [1] : vector<16x256xf32> to vector<16xf32>
    %23 = vector.shape_cast %22 : vector<16xf32> to vector<16x1xf32>
    %c16_i32 = arith.constant 16 : i32
    %24 = arith.muli %arg0, %c16_i32 : i32
    %25 = tpu.iota {dimensions = array<i32: 0>} : vector<16x1xi32>
    %26 = vector.broadcast %24 : i32 to vector<16x1xi32>
    %27 = arith.addi %26, %25 : vector<16x1xi32>
    %c16_i32_8 = arith.constant 16 : i32
    %28 = vector.broadcast %c16_i32_8 : i32 to vector<16x1xi32>
    %29 = arith.cmpi slt, %27, %28 : vector<16x1xi32>
    %cst_9 = arith.constant 0.000000e+00 : f32
    %30 = vector.broadcast %cst_9 : f32 to vector<16x1xf32>
    %31 = arith.select %29, %23, %30 : vector<16x1xi1>, vector<16x1xf32>
    %32 = vector.shape_cast %31 : vector<16x1xf32> to vector<1x16x1xf32>
    %cst_10 = arith.constant dense<0.000000e+00> : vector<1xf32>
    %33 = vector.multi_reduction <add>, %32, %cst_10 [1, 2] : vector<1x16x1xf32> to vector<1xf32>
    %34 = vector.shape_cast %33 : vector<1xf32> to vector<1x1x1xf32>
    %35 = vector.extract %34[0, 0, 0] : f32 from vector<1x1x1xf32>
    %36 = tpu.iota {dimensions = array<i32: 2>} : vector<1x1x128xi32>
    %c0_i32 = arith.constant 0 : i32
    %37 = vector.broadcast %c0_i32 : i32 to vector<1x1x128xi32>
    %38 = arith.cmpi eq, %36, %37 : vector<1x1x128xi32>
    %cst_11 = arith.constant 0.000000e+00 : f32
    %39 = vector.broadcast %35 : f32 to vector<1x1x128xf32>
    %40 = vector.broadcast %cst_11 : f32 to vector<1x1x128xf32>
    %41 = arith.select %38, %39, %40 : vector<1x1x128xi1>, vector<1x1x128xf32>
    %c0_12 = arith.constant 0 : index
    %c0_13 = arith.constant 0 : index
    %c0_14 = arith.constant 0 : index
    %42 = vector.load %arg4[%c0_12, %c0_13, %c0_14] : memref<1x1x128xf32, #tpu.memory_space<vmem>>, vector<1x1x128xf32>
    tpu.vector_store %arg4[%c0_12, %c0_13, %c0_14], %41 {strides = array<i32>} : memref<1x1x128xf32, #tpu.memory_space<vmem>>, vector<1x1x128xf32>,
    return
  }
  func.func @transform_0(%arg0: i32) -> (i32, i32) {
    %c0_i32 = arith.constant 0 : i32
    %c0_i32_0 = arith.constant 0 : i32
    return %arg0, %c0_i32 : i32, i32
  }
  func.func @transform_1(%arg0: i32) -> (i32, i32) {
    %c0_i32 = arith.constant 0 : i32
    %c0_i32_0 = arith.constant 0 : i32
    %c0_i32_1 = arith.constant 0 : i32
    return %c0_i32, %c0_i32_0 : i32, i32
  }
  func.func @transform_2(%arg0: i32) -> (i32, i32) {
    %c0_i32 = arith.constant 0 : i32
    %c0_i32_0 = arith.constant 0 : i32
    return %arg0, %c0_i32 : i32, i32
  }
  func.func @transform_3(%arg0: i32) -> (i32, i32, i32) {
    %c0_i32 = arith.constant 0 : i32
    %c0_i32_0 = arith.constant 0 : i32
    %c0_i32_1 = arith.constant 0 : i32
    return %arg0, %c0_i32, %c0_i32_0 : i32, i32, i32
  }
}

module attributes {stable_mosaic.version = 11 : i64} {
  func.func @bigram_kernel(%arg0: i32, %arg1: memref<16x2xi32, #tpu.memory_space<vmem>>, %arg2: memref<128x256xf32, #tpu.memory_space<vmem>>, %arg3: memref<16x128xf32, #tpu.memory_space<vmem>>, %arg4: memref<1x1x128xf32, #tpu.memory_space<vmem>>) attributes {dimension_semantics = [#tpu.dimension_semantics<parallel>], iteration_bounds = array<i64: 1>, scalar_prefetch = 0 : i64, scratch_operands = 0 : i64, tpu.core_type = #tpu.core_type<tc>, window_params = [{transform_indices = @transform_0, window_bounds = array<i64: 16, 2>}, {pipeline_mode = #tpu.pipeline_mode<synchronous>, transform_indices = @transform_1, window_bounds = array<i64: 128, 256>}, {transform_indices = @transform_2, window_bounds = array<i64: 16, 128>}, {transform_indices = @transform_3, window_bounds = array<i64: 1, 1, 128>}]} {
    %c0 = arith.constant 0 : index
    %c0_0 = arith.constant 0 : index
    %0 = vector.load %arg1[%c0, %c0_0] : memref<16x2xi32, #tpu.memory_space<vmem>>, vector<16x2xi32>
    %1 = vector.extract_strided_slice %0 {offsets = [0, 0], sizes = [16, 1], strides = [1, 1]} : vector<16x2xi32> to vector<16x1xi32>
    %2 = vector.extract_strided_slice %0 {offsets = [0, 1], sizes = [16, 1], strides = [1, 1]} : vector<16x2xi32> to vector<16x1xi32>
    %3 = tpu.iota {dimensions = array<i32: 1>} : vector<16x128xi32>
    %4 = vector.broadcast %1 : vector<16x1xi32> to vector<16x128xi32>
    %5 = arith.cmpi eq, %3, %4 : vector<16x128xi32>
    %6 = arith.extui %5 : vector<16x128xi1> to vector<16x128xi32>
    %7 = arith.sitofp %6 : vector<16x128xi32> to vector<16x128xf32>
    %c0_1 = arith.constant 0 : index
    %c0_2 = arith.constant 0 : index
    %8 = vector.load %arg2[%c0_1, %c0_2] : memref<128x256xf32, #tpu.memory_space<vmem>>, vector<128x256xf32>
    %cst = arith.constant dense<0.000000e+00> : vector<16x256xf32>
    %9 = tpu.matmul %7, %8, %cst {dimension_numbers = #tpu.dot_dimension_numbers<[1], [0], [0], [1], [0, 0, 1, 1], [], []>} : vector<16x128xf32>, vector<128x256xf32>, vector<16x256xf32> -> vector<16x256xf32>
    %10 = vector.extract_strided_slice %9 {offsets = [0, 0], sizes = [16, 128], strides = [1, 1]} : vector<16x256xf32> to vector<16x128xf32>
    %c0_3 = arith.constant 0 : index
    %c0_4 = arith.constant 0 : index
    %11 = vector.load %arg3[%c0_3, %c0_4] : memref<16x128xf32, #tpu.memory_space<vmem>>, vector<16x128xf32>
    tpu.vector_store %arg3[%c0_3, %c0_4], %10 {strides = array<i32>} : memref<16x128xf32, #tpu.memory_space<vmem>>, vector<16x128xf32>,
    %12 = tpu.iota {dimensions = array<i32: 1>} : vector<16x256xi32>
    %c128_i32 = arith.constant 128 : i32
    %13 = vector.broadcast %c128_i32 : i32 to vector<16x256xi32>
    %14 = arith.cmpi eq, %12, %13 : vector<16x256xi32>
    %15 = vector.broadcast %2 : vector<16x1xi32> to vector<16x256xi32>
    %16 = arith.cmpi eq, %12, %15 : vector<16x256xi32>
    %cst_5 = arith.constant 0.000000e+00 : f32
    %17 = vector.broadcast %cst_5 : f32 to vector<16x256xf32>
    %18 = arith.subf %17, %9 : vector<16x256xf32>
    %cst_6 = arith.constant 0.000000e+00 : f32
    %19 = vector.broadcast %cst_6 : f32 to vector<16x256xf32>
    %20 = arith.select %16, %18, %19 : vector<16x256xi1>, vector<16x256xf32>
    %21 = arith.select %14, %9, %20 : vector<16x256xi1>, vector<16x256xf32>
    %cst_7 = arith.constant dense<0.000000e+00> : vector<16xf32>
    %22 = vector.multi_reduction <add>, %21, %cst_7 [1] : vector<16x256xf32> to vector<16xf32>
    %23 = vector.shape_cast %22 : vector<16xf32> to vector<16x1xf32>
    %c16_i32 = arith.constant 16 : i32
    %24 = arith.muli %arg0, %c16_i32 : i32
    %25 = tpu.iota {dimensions = array<i32: 0>} : vector<16x1xi32>
    %26 = vector.broadcast %24 : i32 to vector<16x1xi32>
    %27 = arith.addi %26, %25 : vector<16x1xi32>
    %c16_i32_8 = arith.constant 16 : i32
    %28 = vector.broadcast %c16_i32_8 : i32 to vector<16x1xi32>
    %29 = arith.cmpi slt, %27, %28 : vector<16x1xi32>
    %cst_9 = arith.constant 0.000000e+00 : f32
    %30 = vector.broadcast %cst_9 : f32 to vector<16x1xf32>
    %31 = arith.select %29, %23, %30 : vector<16x1xi1>, vector<16x1xf32>
    %32 = vector.shape_cast %31 : vector<16x1xf32> to vector<1x16x1xf32>
    %cst_10 = arith.constant dense<0.000000e+00> : vector<1xf32>
    %33 = vector.multi_reduction <add>, %32, %cst_10 [1, 2] : vector<1x16x1xf32> to vector<1xf32>
    %34 = vector.shape_cast %33 : vector<1xf32> to vector<1x1x1xf32>
    %35 = vector.extract %34[0, 0, 0] : f32 from vector<1x1x1xf32>
    %36 = tpu.iota {dimensions = array<i32: 2>} : vector<1x1x128xi32>
    %c0_i32 = arith.constant 0 : i32
    %37 = vector.broadcast %c0_i32 : i32 to vector<1x1x128xi32>
    %38 = arith.cmpi eq, %36, %37 : vector<1x1x128xi32>
    %cst_11 = arith.constant 0.000000e+00 : f32
    %39 = vector.broadcast %35 : f32 to vector<1x1x128xf32>
    %40 = vector.broadcast %cst_11 : f32 to vector<1x1x128xf32>
    %41 = arith.select %38, %39, %40 : vector<1x1x128xi1>, vector<1x1x128xf32>
    %c0_12 = arith.constant 0 : index
    %c0_13 = arith.constant 0 : index
    %c0_14 = arith.constant 0 : index
    %42 = vector.load %arg4[%c0_12, %c0_13, %c0_14] : memref<1x1x128xf32, #tpu.memory_space<vmem>>, vector<1x1x128xf32>
    tpu.vector_store %arg4[%c0_12, %c0_13, %c0_14], %41 {strides = array<i32>} : memref<1x1x128xf32, #tpu.memory_space<vmem>>, vector<1x1x128xf32>,
    return
  }
  func.func @transform_0(%arg0: i32) -> (i32, i32) {
    %c0_i32 = arith.constant 0 : i32
    %c0_i32_0 = arith.constant 0 : i32
    return %arg0, %c0_i32 : i32, i32
  }
  func.func @transform_1(%arg0: i32) -> (i32, i32) {
    %c0_i32 = arith.constant 0 : i32
    %c0_i32_0 = arith.constant 0 : i32
    %c0_i32_1 = arith.constant 0 : i32
    return %c0_i32, %c0_i32_0 : i32, i32
  }
  func.func @transform_2(%arg0: i32) -> (i32, i32) {
    %c0_i32 = arith.constant 0 : i32
    %c0_i32_0 = arith.constant 0 : i32
    return %arg0, %c0_i32 : i32, i32
  }
  func.func @transform_3(%arg0: i32) -> (i32, i32, i32) {
    %c0_i32 = arith.constant 0 : i32
    %c0_i32_0 = arith.constant 0 : i32
    %c0_i32_1 = arith.constant 0 : i32
    return %arg0, %c0_i32, %c0_i32_0 : i32, i32, i32
  }
}

</mosaic_0001>

<bundles_post_ra>
// kernel: tpu_custom_call.1
= control target key start
LH: loop header
LB: loop body
LE: loop exit
PB: predicated region body
PF: predicated region fallthrough
CT: control target
= control target key end

     0   :  { %9 = vsyncpa [#allocation3], 0  ;;  %s413_s0 = inlined_call_operand.vmem [shape: s32[16,2], index: 0, kind: input, shape index: {}]   ;;  %s414_s1 = inlined_call_operand.hbm [shape: f32[128,256], index: 1, kind: input, shape index: {}]   ;;  %s415_s2 = inlined_call_operand.hbm [shape: f32[16,128], index: 2, kind: output, shape index: {0}]   ;;  %s416_s3 = inlined_call_operand.hbm [shape: f32[1,1,128], index: 3, kind: output, shape index: {1}]  }
   0x1   :  { %10 = vsyncpa [#allocation4], 0 }
   0x2   :  { %11 = vsyncpa [#allocation7], 0  ;;  %s18_s14 = sshll.u32 %s414_s1, 4  ;;  %s352_s15 = smov [#allocation2]   ;;  %s19_s14 = int_to_ptr.hbm [resolvable:$true] %s18_s14 }
   0x3   :  { %s20_s16 = sshll.u32 %s352_s15, 4  ;;  %s353_s17 = smov 256   ;;  %s21_s16 = int_to_ptr.vmem [resolvable:$true] %s20_s16 }
   0x4   :  { %s354_s18 = smov 16  }
   0x5   :  { %26 = dma.hbm_to_vmem [thread:$0]  %s19_s14, 4096, %s21_s16, [#allocation3], %s353_s17, %s353_s17, %s354_s18  }
   0x6   :  { %346 = dma.done.wait [#allocation3], 4096  }
   0x7   :  { %347 = vsyncadd [#allocation3], 4294963200  ;;  %v355_v0 = vmov 0   ;;  %v388_v1 = vld [vmem:[%s413_s0 + $0x8] sm:$0xff]  ;;  %v77_v2 = vld [vmem:[#allocation2 + $0xf0] sm:$0xff]  ;;  %v356_v35 = vmov 1   ;;  %v33_v36 = vlaneseq }
   0x8   :  { %271 = vset.pattern.permute.xlu0 %v355_v0  ;;  %227 = vmatpush.msra.mxu2 %v77_v2  ;;  %v78_v3 = vld [vmem:[#allocation2 + $0xf8] sm:$0xff]  ;;  %v75_v4 = vld [vmem:[#allocation2 + $0xe0] sm:$0xff]  ;;  %v76_v5 = vld [vmem:[#allocation2 + $0xe8] sm:$0xff]  ;;  %v357_v39 = vmov 1.0   ;;  %vm169_vm7 = vcmask 7168   ;;  %s192_s25 = sshll.u32 %s415_s2, 4  ;;  %s193_s25 = int_to_ptr.hbm [resolvable:$true] %s192_s25 }
   0x9   :  { %39 = vperm.xlu0 %271, %v388_v1   ;;  %243 = vmatpush.msra.mxu3 %v78_v3  ;;  %v73_v6 = vld [vmem:[#allocation2 + $0xd0] sm:$0xff]  ;;  %v74_v7 = vld [vmem:[#allocation2 + $0xd8] sm:$0xff]  ;;  %v71_v8 = vld [vmem:[#allocation2 + $0xc0] sm:$0xff]  ;;  %v399_v37 = vand.u32 127, %v33_v36  ;;  %s359_s26 = smov 128   ;;  %s360_s27 = smov 8  }
   0xa   :  { %79 = vmatpush.msra.mxu0 %v77_v2  ;;  %228 = vmatpush.msra.mxu2 %v75_v4  ;;  %v72_v9 = vld [vmem:[#allocation2 + $0xc8] sm:$0xff]  ;;  %v394_v10 = vld [vmem:[%s413_s0] sm:$0xff]  ;;  %v69_v11 = vld [vmem:[#allocation2 + $0xb0] sm:$0xff]  ;;  %s358_s0 = smov [#allocation5]   ;;  %s361_s28 = smov [#allocation6]  }
   0xb   :  { %102 = vmatpush.msra.mxu1 %v78_v3  ;;  %244 = vmatpush.msra.mxu3 %v76_v5  ;;  %v70_v12 = vld [vmem:[#allocation2 + $0xb8] sm:$0xff]  ;;  %v67_v13 = vld [vmem:[#allocation2 + $0xa0] sm:$0xff]  ;;  %v68_v14 = vld [vmem:[#allocation2 + $0xa8] sm:$0xff]  ;;  %v127_v42 = vadd.s32 128, %v399_v37  ;;  %s190_s22 = sshll.u32 %s358_s0, 4  ;;  %s204_s29 = sshll.u32 %s361_s28, 4  ;;  %s191_s22 = int_to_ptr.vmem [resolvable:$true] %s190_s22  ;;  %s205_s29 = int_to_ptr.vmem [resolvable:$true] %s204_s29 }
   0xc   :  { %80 = vmatpush.msra.mxu0 %v75_v4  ;;  %229 = vmatpush.msra.mxu2 %v73_v6  ;;  %v65_v15 = vld [vmem:[#allocation2 + $0x90] sm:$0xff]  ;;  %v66_v16 = vld [vmem:[#allocation2 + $0x98] sm:$0xff]  ;;  %v63_v17 = vld [vmem:[#allocation2 + $0x80] sm:$0xff]  ;;  %s206_s5 = sshll.u32 %s416_s3, 4  ;;  %vm182_vm8 = vcmp.eq.s32.totalorder %v399_v37, 0  ;;  %s207_s5 = int_to_ptr.hbm [resolvable:$true] %s206_s5 }
   0xd   :  { %103 = vmatpush.msra.mxu1 %v76_v5  ;;  %245 = vmatpush.msra.mxu3 %v74_v7  ;;  %v64_v18 = vld [vmem:[#allocation2 + $0x88] sm:$0xff]  ;;  %v61_v19 = vld [vmem:[#allocation2 + $0x70] sm:$0xff]  ;;  %v62_v20 = vld [vmem:[#allocation2 + $0x78] sm:$0xff]  ;;  %vm129_vm4 = vcmp.eq.s32.totalorder %v127_v42, 128 }
   0xe   :  { %81 = vmatpush.msra.mxu0 %v73_v6  ;;  %230 = vmatpush.msra.mxu2 %v71_v8  ;;  %v59_v21 = vld [vmem:[#allocation2 + $0x60] sm:$0xff]  ;;  %v60_v22 = vld [vmem:[#allocation2 + $0x68] sm:$0xff]  ;;  %v57_v23 = vld [vmem:[#allocation2 + $0x50] sm:$0xff] }
   0xf   :  { %104 = vmatpush.msra.mxu1 %v74_v7  ;;  %246 = vmatpush.msra.mxu3 %v72_v9  ;;  %v58_v24 = vld [vmem:[#allocation2 + $0x58] sm:$0xff]  ;;  %v55_v25 = vld [vmem:[#allocation2 + $0x40] sm:$0xff]  ;;  %v56_v26 = vld [vmem:[#allocation2 + $0x48] sm:$0xff] }
  0x10   :  { %82 = vmatpush.msra.mxu0 %v71_v8  ;;  %231 = vmatpush.msra.mxu2 %v69_v11  ;;  %v53_v27 = vld [vmem:[#allocation2 + $0x30] sm:$0xff]  ;;  %v54_v28 = vld [vmem:[#allocation2 + $0x38] sm:$0xff]  ;;  %v51_v29 = vld [vmem:[#allocation2 + $0x20] sm:$0xff] }
  0x11   :  { %36 = vperm.xlu0 %271, %v394_v10   ;;  %247 = vmatpush.msra.mxu3 %v70_v12  ;;  %v52_v30 = vld [vmem:[#allocation2 + $0x28] sm:$0xff]  ;;  %v49_v31 = vld [vmem:[#allocation2 + $0x10] sm:$0xff]  ;;  %v50_v32 = vld [vmem:[#allocation2 + $0x18] sm:$0xff] }
  0x12   :  { %105 = vmatpush.msra.mxu1 %v72_v9  ;;  %232 = vmatpush.msra.mxu2 %v67_v13  ;;  %v47_v33 = vld [vmem:[#allocation2] sm:$0xff]  ;;  %v48_v34 = vld [vmem:[#allocation2 + $0x8] sm:$0xff] }
  0x13   :  { %83 = vmatpush.msra.mxu0 %v69_v11  ;;  %248 = vmatpush.msra.mxu3 %v68_v14 }
  0x14   :  { %106 = vmatpush.msra.mxu1 %v70_v12  ;;  %233 = vmatpush.msra.mxu2 %v65_v15 }
  0x15   :  { %84 = vmatpush.msra.mxu0 %v67_v13  ;;  %249 = vmatpush.msra.mxu3 %v66_v16 }
  0x16   :  { %107 = vmatpush.msra.mxu1 %v68_v14  ;;  %234 = vmatpush.msra.mxu2 %v63_v17 }
  0x17   :  { %85 = vmatpush.msra.mxu0 %v65_v15  ;;  %250 = vmatpush.msra.mxu3 %v64_v18 }
  0x18   :  { %108 = vmatpush.msra.mxu1 %v66_v16  ;;  %235 = vmatpush.msra.mxu2 %v61_v19 }
  0x19   :  { %86 = vmatpush.msra.mxu0 %v63_v17  ;;  %251 = vmatpush.msra.mxu3 %v62_v20 }
  0x1a   :  { %109 = vmatpush.msra.mxu1 %v64_v18  ;;  %236 = vmatpush.msra.mxu2 %v59_v21 }
  0x1b   :  { %87 = vmatpush.msra.mxu0 %v61_v19  ;;  %252 = vmatpush.msra.mxu3 %v60_v22 }
  0x1c   :  { %110 = vmatpush.msra.mxu1 %v62_v20  ;;  %237 = vmatpush.msra.mxu2 %v57_v23 }
  0x1d   :  { %88 = vmatpush.msra.mxu0 %v59_v21  ;;  %253 = vmatpush.msra.mxu3 %v58_v24 }
  0x1e   :  { %111 = vmatpush.msra.mxu1 %v60_v22  ;;  %238 = vmatpush.msra.mxu2 %v55_v25 }
  0x1f   :  { %89 = vmatpush.msra.mxu0 %v57_v23  ;;  %254 = vmatpush.msra.mxu3 %v56_v26 }
  0x20   :  { %112 = vmatpush.msra.mxu1 %v58_v24  ;;  %239 = vmatpush.msra.mxu2 %v53_v27 }
  0x21   :  { %90 = vmatpush.msra.mxu0 %v55_v25  ;;  %255 = vmatpush.msra.mxu3 %v54_v28 }
  0x22   :  { %113 = vmatpush.msra.mxu1 %v56_v26  ;;  %240 = vmatpush.msra.mxu2 %v51_v29 }
  0x23   :  { %91 = vmatpush.msra.mxu0 %v53_v27  ;;  %256 = vmatpush.msra.mxu3 %v52_v30 }
  0x24   :  { %114 = vmatpush.msra.mxu1 %v54_v28  ;;  %241 = vmatpush.msra.mxu2 %v49_v31 }
  0x25   :  { %92 = vmatpush.msra.mxu0 %v51_v29  ;;  %257 = vmatpush.msra.mxu3 %v50_v32 }
  0x26   :  { %115 = vmatpush.msra.mxu1 %v52_v30  ;;  %242 = vmatpush.msra.mxu2 %v47_v33 }
  0x27   :  { %93 = vmatpush.msra.mxu0 %v49_v31  ;;  %258 = vmatpush.msra.mxu3 %v48_v34 }
  0x28   :  { %116 = vmatpush.msra.mxu1 %v50_v32  ;;  %272 = vset.pattern.permute.xlu1 %v356_v35 }
  0x29   :  { %94 = vmatpush.msra.mxu0 %v47_v33  ;;  %273 = vset.pattern.permute.xlu0 %v356_v35 }
  0x2a   :  { %117 = vmatpush.msra.mxu1 %v48_v34  ;;  %131 = vperm.xlu1 %272, %v394_v10  }
  0x32   :  { %134 = vperm.xlu1 %272, %v388_v1  }
  0x7b   :  { %v40_v38 = vpop.permute.xlu0 %39 }
  0x7c   :  { %vm42_vm0 = vcmp.eq.s32.totalorder %v399_v37, %v40_v38 }
  0x7d   :  { %224 = vmatmul.msk.f32.vlgmr.msra.gmra.mxu2 %vm42_vm0, %v357_v39  ;;  %226 = vmatmul.msk.f32.vlgmr.msra.gmra.mxu3 %vm42_vm0, %v357_v39 }
  0x83   :  { %v37_v40 = vpop.permute.xlu0 %36 }
  0x84   :  { %vm41_vm1 = vcmp.eq.s32.totalorder %v399_v37, %v37_v40 }
  0x85   :  { %223 = vmatmul.msk.f32.vlgmr.msra.gmra.mxu0 %vm41_vm1, %v357_v39  ;;  %225 = vmatmul.msk.f32.vlgmr.msra.gmra.mxu1 %vm41_vm1, %v357_v39 }
  0x9c   :  { %v132_v41 = vpop.permute.xlu1 %131 }
  0x9d   :  { %vm136_vm2 = vcmp.eq.s32.totalorder %v399_v37, %v132_v41  ;;  %vm137_vm3 = vcmp.eq.s32.totalorder %v127_v42, %v132_v41 }
  0xa4   :  { %v135_v47 = vpop.permute.xlu1 %134 }
  0xa5   :  { %vm139_vm5 = vcmp.eq.s32.totalorder %v127_v42, %v135_v47  ;;  %vm138_vm6 = vcmp.eq.s32.totalorder %v399_v37, %v135_v47 }
 0x100   :  { %v99_v43 = vpop.f32.mrf.mxu2  ;;  %v122_v44 = vpop.f32.mrf.mxu3 }
 0x101   :  { %126 = vst [vmem:[#allocation5 + $0x8] sm:$0xff] %v99_v43  ;;  %v143_v50 = vsub.f32 0.0, %v122_v44  ;;  %v142_v55 = vsub.f32 0.0, %v99_v43 }
 0x102   :  { %v96_v45 = vpop.f32.mrf.mxu0  ;;  %v119_v46 = vpop.f32.mrf.mxu1 }
 0x103   :  { %125 = vst [vmem:[#allocation5] sm:$0xff] %v96_v45  ;;  %v140_v48 = vsub.f32 0.0, %v96_v45  ;;  %v141_v49 = vsub.f32 0.0, %v119_v46  ;;  %v147_v56 = vsel %vm139_vm5, %v143_v50, 0.0  ;;  %v146_v57 = vsel %vm138_vm6, %v142_v55, 0.0 }
 0x104   :  { %v151_v58 = vsel %vm129_vm4, %v122_v44, %v147_v56  ;;  %198 = dma.vmem_to_hbm [thread:$0]  %s191_s22, 256, %s193_s25, [#allocation4], %s359_s26, %s359_s26, %s360_s27  }
 0x105   :  { %v145_v51 = vsel %vm137_vm3, %v141_v49, 0.0  ;;  %v144_v52 = vsel %vm136_vm2, %v140_v48, 0.0  ;;  %v155_v59 = vadd.f32 %v151_v58, %v146_v57 }
 0x106   :  { %v149_v53 = vsel %vm129_vm4, %v119_v46, %v145_v51 }
 0x107   :  { %v152_v54 = vadd.f32 %v149_v53, %v144_v52 }
 0x109   :  { %153 = vadd.xlane.f32.xlu2 %v152_v54 }
 0x111   :  { %156 = vadd.xlane.f32.xlu2 %v155_v59 }
 0x17c   :  { %v154_v60 = vpop.xlane.xlu2 %153 }
 0x17d   :  { %v170_v62 = vsel %vm169_vm7, %v154_v60, 0.0 }
 0x184   :  { %v157_v61 = vpop.xlane.xlu2 %156 }
 0x185   :  { %v171_v63 = vsel %vm169_vm7, %v157_v61, 0.0 }
 0x186   :  { %v172_v0 = vadd.f32 %v171_v63, %v170_v62 }
 0x188   :  { %173 = vadd.xlane.f32.xlu0 %v172_v0 }
 0x1fb   :  { %v174_v1 = vpop.xlane.xlu0 %173 }
 0x1fc   :  { %v175_v2 = vrot.slane %v174_v1, 4 }
 0x1fe   :  { %v176_v3 = vadd.f32 %v175_v2, %v174_v1 }
 0x200   :  { %v177_v4 = vrot.slane %v176_v3, 2 }
 0x202   :  { %v178_v5 = vadd.f32 %v177_v4, %v176_v3 }
 0x204   :  { %v179_v6 = vrot.slane %v178_v5, 1 }
 0x206   :  { %v180_v7 = vadd.f32 %v179_v6, %v178_v5 }
 0x208   :  { %259 = vpush %v180_v7 }
 0x239   :  { %s260_s2 = spop %259 }
 0x23a   :  { %v183_v8 = vstv %s260_s2 }
 0x23b   :  { %v184_v9 = vsel %vm182_vm8, %v183_v8, 0.0 }
 0x23c   :  { %185 = vst [vmem:[#allocation6] sm:$0x1] %v184_v9 }
 0x23d   :  { %209 = dma.vmem_to_hbm [thread:$0]  %s205_s29, 16, %s207_s5, [#allocation7]  }
 0x23e   :  { %348 = dma.done.wait [#allocation4], 256  }
 0x23f   :  { %349 = vsyncadd [#allocation4], 4294967040 }
 0x240   :  { %350 = dma.done.wait [#allocation7], 16  }
 0x241   :  { %351 = vsyncadd [#allocation7], 4294967280 }
 0x242   :  { %218 = vsyncpa [#allocation3], 1 }
 0x243   :  { %219 = vsyncpa [#allocation4], 1 }
 0x244   :  { %220 = vsyncpa [#allocation7], 1 }

// kernel: tpu_custom_call.1
= control target key start
LH: loop header
LB: loop body
LE: loop exit
PB: predicated region body
PF: predicated region fallthrough
CT: control target
= control target key end

     0   :  { %9 = vsyncpa [#allocation3], 0  ;;  %s413_s0 = inlined_call_operand.vmem [shape: s32[16,2], index: 0, kind: input, shape index: {}]   ;;  %s414_s1 = inlined_call_operand.hbm [shape: f32[128,256], index: 1, kind: input, shape index: {}]   ;;  %s415_s2 = inlined_call_operand.hbm [shape: f32[16,128], index: 2, kind: output, shape index: {0}]   ;;  %s416_s3 = inlined_call_operand.hbm [shape: f32[1,1,128], index: 3, kind: output, shape index: {1}]  }
   0x1   :  { %10 = vsyncpa [#allocation4], 0 }
   0x2   :  { %11 = vsyncpa [#allocation7], 0  ;;  %s18_s14 = sshll.u32 %s414_s1, 4  ;;  %s352_s15 = smov [#allocation2]   ;;  %s19_s14 = int_to_ptr.hbm [resolvable:$true] %s18_s14 }
   0x3   :  { %s20_s16 = sshll.u32 %s352_s15, 4  ;;  %s353_s17 = smov 256   ;;  %s21_s16 = int_to_ptr.vmem [resolvable:$true] %s20_s16 }
   0x4   :  { %s354_s18 = smov 16  }
   0x5   :  { %26 = dma.hbm_to_vmem [thread:$0]  %s19_s14, 4096, %s21_s16, [#allocation3], %s353_s17, %s353_s17, %s354_s18  }
   0x6   :  { %346 = dma.done.wait [#allocation3], 4096  }
   0x7   :  { %347 = vsyncadd [#allocation3], 4294963200  ;;  %v355_v0 = vmov 0   ;;  %v388_v1 = vld [vmem:[%s413_s0 + $0x8] sm:$0xff]  ;;  %v77_v2 = vld [vmem:[#allocation2 + $0xf0] sm:$0xff]  ;;  %v356_v35 = vmov 1   ;;  %v33_v36 = vlaneseq }
   0x8   :  { %271 = vset.pattern.permute.xlu0 %v355_v0  ;;  %227 = vmatpush.msra.mxu2 %v77_v2  ;;  %v78_v3 = vld [vmem:[#allocation2 + $0xf8] sm:$0xff]  ;;  %v75_v4 = vld [vmem:[#allocation2 + $0xe0] sm:$0xff]  ;;  %v76_v5 = vld [vmem:[#allocation2 + $0xe8] sm:$0xff]  ;;  %v357_v39 = vmov 1.0   ;;  %vm169_vm7 = vcmask 7168   ;;  %s192_s25 = sshll.u32 %s415_s2, 4  ;;  %s193_s25 = int_to_ptr.hbm [resolvable:$true] %s192_s25 }
   0x9   :  { %39 = vperm.xlu0 %271, %v388_v1   ;;  %243 = vmatpush.msra.mxu3 %v78_v3  ;;  %v73_v6 = vld [vmem:[#allocation2 + $0xd0] sm:$0xff]  ;;  %v74_v7 = vld [vmem:[#allocation2 + $0xd8] sm:$0xff]  ;;  %v71_v8 = vld [vmem:[#allocation2 + $0xc0] sm:$0xff]  ;;  %v399_v37 = vand.u32 127, %v33_v36  ;;  %s359_s26 = smov 128   ;;  %s360_s27 = smov 8  }
   0xa   :  { %79 = vmatpush.msra.mxu0 %v77_v2  ;;  %228 = vmatpush.msra.mxu2 %v75_v4  ;;  %v72_v9 = vld [vmem:[#allocation2 + $0xc8] sm:$0xff]  ;;  %v394_v10 = vld [vmem:[%s413_s0] sm:$0xff]  ;;  %v69_v11 = vld [vmem:[#allocation2 + $0xb0] sm:$0xff]  ;;  %s358_s0 = smov [#allocation5]   ;;  %s361_s28 = smov [#allocation6]  }
   0xb   :  { %102 = vmatpush.msra.mxu1 %v78_v3  ;;  %244 = vmatpush.msra.mxu3 %v76_v5  ;;  %v70_v12 = vld [vmem:[#allocation2 + $0xb8] sm:$0xff]  ;;  %v67_v13 = vld [vmem:[#allocation2 + $0xa0] sm:$0xff]  ;;  %v68_v14 = vld [vmem:[#allocation2 + $0xa8] sm:$0xff]  ;;  %v127_v42 = vadd.s32 128, %v399_v37  ;;  %s190_s22 = sshll.u32 %s358_s0, 4  ;;  %s204_s29 = sshll.u32 %s361_s28, 4  ;;  %s191_s22 = int_to_ptr.vmem [resolvable:$true] %s190_s22  ;;  %s205_s29 = int_to_ptr.vmem [resolvable:$true] %s204_s29 }
   0xc   :  { %80 = vmatpush.msra.mxu0 %v75_v4  ;;  %229 = vmatpush.msra.mxu2 %v73_v6  ;;  %v65_v15 = vld [vmem:[#allocation2 + $0x90] sm:$0xff]  ;;  %v66_v16 = vld [vmem:[#allocation2 + $0x98] sm:$0xff]  ;;  %v63_v17 = vld [vmem:[#allocation2 + $0x80] sm:$0xff]  ;;  %s206_s5 = sshll.u32 %s416_s3, 4  ;;  %vm182_vm8 = vcmp.eq.s32.totalorder %v399_v37, 0  ;;  %s207_s5 = int_to_ptr.hbm [resolvable:$true] %s206_s5 }
   0xd   :  { %103 = vmatpush.msra.mxu1 %v76_v5  ;;  %245 = vmatpush.msra.mxu3 %v74_v7  ;;  %v64_v18 = vld [vmem:[#allocation2 + $0x88] sm:$0xff]  ;;  %v61_v19 = vld [vmem:[#allocation2 + $0x70] sm:$0xff]  ;;  %v62_v20 = vld [vmem:[#allocation2 + $0x78] sm:$0xff]  ;;  %vm129_vm4 = vcmp.eq.s32.totalorder %v127_v42, 128 }
   0xe   :  { %81 = vmatpush.msra.mxu0 %v73_v6  ;;  %230 = vmatpush.msra.mxu2 %v71_v8  ;;  %v59_v21 = vld [vmem:[#allocation2 + $0x60] sm:$0xff]  ;;  %v60_v22 = vld [vmem:[#allocation2 + $0x68] sm:$0xff]  ;;  %v57_v23 = vld [vmem:[#allocation2 + $0x50] sm:$0xff] }
   0xf   :  { %104 = vmatpush.msra.mxu1 %v74_v7  ;;  %246 = vmatpush.msra.mxu3 %v72_v9  ;;  %v58_v24 = vld [vmem:[#allocation2 + $0x58] sm:$0xff]  ;;  %v55_v25 = vld [vmem:[#allocation2 + $0x40] sm:$0xff]  ;;  %v56_v26 = vld [vmem:[#allocation2 + $0x48] sm:$0xff] }
  0x10   :  { %82 = vmatpush.msra.mxu0 %v71_v8  ;;  %231 = vmatpush.msra.mxu2 %v69_v11  ;;  %v53_v27 = vld [vmem:[#allocation2 + $0x30] sm:$0xff]  ;;  %v54_v28 = vld [vmem:[#allocation2 + $0x38] sm:$0xff]  ;;  %v51_v29 = vld [vmem:[#allocation2 + $0x20] sm:$0xff] }
  0x11   :  { %36 = vperm.xlu0 %271, %v394_v10   ;;  %247 = vmatpush.msra.mxu3 %v70_v12  ;;  %v52_v30 = vld [vmem:[#allocation2 + $0x28] sm:$0xff]  ;;  %v49_v31 = vld [vmem:[#allocation2 + $0x10] sm:$0xff]  ;;  %v50_v32 = vld [vmem:[#allocation2 + $0x18] sm:$0xff] }
  0x12   :  { %105 = vmatpush.msra.mxu1 %v72_v9  ;;  %232 = vmatpush.msra.mxu2 %v67_v13  ;;  %v47_v33 = vld [vmem:[#allocation2] sm:$0xff]  ;;  %v48_v34 = vld [vmem:[#allocation2 + $0x8] sm:$0xff] }
  0x13   :  { %83 = vmatpush.msra.mxu0 %v69_v11  ;;  %248 = vmatpush.msra.mxu3 %v68_v14 }
  0x14   :  { %106 = vmatpush.msra.mxu1 %v70_v12  ;;  %233 = vmatpush.msra.mxu2 %v65_v15 }
  0x15   :  { %84 = vmatpush.msra.mxu0 %v67_v13  ;;  %249 = vmatpush.msra.mxu3 %v66_v16 }
  0x16   :  { %107 = vmatpush.msra.mxu1 %v68_v14  ;;  %234 = vmatpush.msra.mxu2 %v63_v17 }
  0x17   :  { %85 = vmatpush.msra.mxu0 %v65_v15  ;;  %250 = vmatpush.msra.mxu3 %v64_v18 }
  0x18   :  { %108 = vmatpush.msra.mxu1 %v66_v16  ;;  %235 = vmatpush.msra.mxu2 %v61_v19 }
  0x19   :  { %86 = vmatpush.msra.mxu0 %v63_v17  ;;  %251 = vmatpush.msra.mxu3 %v62_v20 }
  0x1a   :  { %109 = vmatpush.msra.mxu1 %v64_v18  ;;  %236 = vmatpush.msra.mxu2 %v59_v21 }
  0x1b   :  { %87 = vmatpush.msra.mxu0 %v61_v19  ;;  %252 = vmatpush.msra.mxu3 %v60_v22 }
  0x1c   :  { %110 = vmatpush.msra.mxu1 %v62_v20  ;;  %237 = vmatpush.msra.mxu2 %v57_v23 }
  0x1d   :  { %88 = vmatpush.msra.mxu0 %v59_v21  ;;  %253 = vmatpush.msra.mxu3 %v58_v24 }
  0x1e   :  { %111 = vmatpush.msra.mxu1 %v60_v22  ;;  %238 = vmatpush.msra.mxu2 %v55_v25 }
  0x1f   :  { %89 = vmatpush.msra.mxu0 %v57_v23  ;;  %254 = vmatpush.msra.mxu3 %v56_v26 }
  0x20   :  { %112 = vmatpush.msra.mxu1 %v58_v24  ;;  %239 = vmatpush.msra.mxu2 %v53_v27 }
  0x21   :  { %90 = vmatpush.msra.mxu0 %v55_v25  ;;  %255 = vmatpush.msra.mxu3 %v54_v28 }
  0x22   :  { %113 = vmatpush.msra.mxu1 %v56_v26  ;;  %240 = vmatpush.msra.mxu2 %v51_v29 }
  0x23   :  { %91 = vmatpush.msra.mxu0 %v53_v27  ;;  %256 = vmatpush.msra.mxu3 %v52_v30 }
  0x24   :  { %114 = vmatpush.msra.mxu1 %v54_v28  ;;  %241 = vmatpush.msra.mxu2 %v49_v31 }
  0x25   :  { %92 = vmatpush.msra.mxu0 %v51_v29  ;;  %257 = vmatpush.msra.mxu3 %v50_v32 }
  0x26   :  { %115 = vmatpush.msra.mxu1 %v52_v30  ;;  %242 = vmatpush.msra.mxu2 %v47_v33 }
  0x27   :  { %93 = vmatpush.msra.mxu0 %v49_v31  ;;  %258 = vmatpush.msra.mxu3 %v48_v34 }
  0x28   :  { %116 = vmatpush.msra.mxu1 %v50_v32  ;;  %272 = vset.pattern.permute.xlu1 %v356_v35 }
  0x29   :  { %94 = vmatpush.msra.mxu0 %v47_v33  ;;  %273 = vset.pattern.permute.xlu0 %v356_v35 }
  0x2a   :  { %117 = vmatpush.msra.mxu1 %v48_v34  ;;  %131 = vperm.xlu1 %272, %v394_v10  }
  0x32   :  { %134 = vperm.xlu1 %272, %v388_v1  }
  0x7b   :  { %v40_v38 = vpop.permute.xlu0 %39 }
  0x7c   :  { %vm42_vm0 = vcmp.eq.s32.totalorder %v399_v37, %v40_v38 }
  0x7d   :  { %224 = vmatmul.msk.f32.vlgmr.msra.gmra.mxu2 %vm42_vm0, %v357_v39  ;;  %226 = vmatmul.msk.f32.vlgmr.msra.gmra.mxu3 %vm42_vm0, %v357_v39 }
  0x83   :  { %v37_v40 = vpop.permute.xlu0 %36 }
  0x84   :  { %vm41_vm1 = vcmp.eq.s32.totalorder %v399_v37, %v37_v40 }
  0x85   :  { %223 = vmatmul.msk.f32.vlgmr.msra.gmra.mxu0 %vm41_vm1, %v357_v39  ;;  %225 = vmatmul.msk.f32.vlgmr.msra.gmra.mxu1 %vm41_vm1, %v357_v39 }
  0x9c   :  { %v132_v41 = vpop.permute.xlu1 %131 }
  0x9d   :  { %vm136_vm2 = vcmp.eq.s32.totalorder %v399_v37, %v132_v41  ;;  %vm137_vm3 = vcmp.eq.s32.totalorder %v127_v42, %v132_v41 }
  0xa4   :  { %v135_v47 = vpop.permute.xlu1 %134 }
  0xa5   :  { %vm139_vm5 = vcmp.eq.s32.totalorder %v127_v42, %v135_v47  ;;  %vm138_vm6 = vcmp.eq.s32.totalorder %v399_v37, %v135_v47 }
 0x100   :  { %v99_v43 = vpop.f32.mrf.mxu2  ;;  %v122_v44 = vpop.f32.mrf.mxu3 }
 0x101   :  { %126 = vst [vmem:[#allocation5 + $0x8] sm:$0xff] %v99_v43  ;;  %v143_v50 = vsub.f32 0.0, %v122_v44  ;;  %v142_v55 = vsub.f32 0.0, %v99_v43 }
 0x102   :  { %v96_v45 = vpop.f32.mrf.mxu0  ;;  %v119_v46 = vpop.f32.mrf.mxu1 }
 0x103   :  { %125 = vst [vmem:[#allocation5] sm:$0xff] %v96_v45  ;;  %v140_v48 = vsub.f32 0.0, %v96_v45  ;;  %v141_v49 = vsub.f32 0.0, %v119_v46  ;;  %v147_v56 = vsel %vm139_vm5, %v143_v50, 0.0  ;;  %v146_v57 = vsel %vm138_vm6, %v142_v55, 0.0 }
 0x104   :  { %v151_v58 = vsel %vm129_vm4, %v122_v44, %v147_v56  ;;  %198 = dma.vmem_to_hbm [thread:$0]  %s191_s22, 256, %s193_s25, [#allocation4], %s359_s26, %s359_s26, %s360_s27  }
 0x105   :  { %v145_v51 = vsel %vm137_vm3, %v141_v49, 0.0  ;;  %v144_v52 = vsel %vm136_vm2, %v140_v48, 0.0  ;;  %v155_v59 = vadd.f32 %v151_v58, %v146_v57 }
 0x106   :  { %v149_v53 = vsel %vm129_vm4, %v119_v46, %v145_v51 }
 0x107   :  { %v152_v54 = vadd.f32 %v149_v53, %v144_v52 }
 0x109   :  { %153 = vadd.xlane.f32.xlu2 %v152_v54 }
 0x111   :  { %156 = vadd.xlane.f32.xlu2 %v155_v59 }
 0x17c   :  { %v154_v60 = vpop.xlane.xlu2 %153 }
 0x17d   :  { %v170_v62 = vsel %vm169_vm7, %v154_v60, 0.0 }
 0x184   :  { %v157_v61 = vpop.xlane.xlu2 %156 }
 0x185   :  { %v171_v63 = vsel %vm169_vm7, %v157_v61, 0.0 }
 0x186   :  { %v172_v0 = vadd.f32 %v171_v63, %v170_v62 }
 0x188   :  { %173 = vadd.xlane.f32.xlu0 %v172_v0 }
 0x1fb   :  { %v174_v1 = vpop.xlane.xlu0 %173 }
 0x1fc   :  { %v175_v2 = vrot.slane %v174_v1, 4 }
 0x1fe   :  { %v176_v3 = vadd.f32 %v175_v2, %v174_v1 }
 0x200   :  { %v177_v4 = vrot.slane %v176_v3, 2 }
 0x202   :  { %v178_v5 = vadd.f32 %v177_v4, %v176_v3 }
 0x204   :  { %v179_v6 = vrot.slane %v178_v5, 1 }
 0x206   :  { %v180_v7 = vadd.f32 %v179_v6, %v178_v5 }
 0x208   :  { %259 = vpush %v180_v7 }
 0x239   :  { %s260_s2 = spop %259 }
 0x23a   :  { %v183_v8 = vstv %s260_s2 }
 0x23b   :  { %v184_v9 = vsel %vm182_vm8, %v183_v8, 0.0 }
 0x23c   :  { %185 = vst [vmem:[#allocation6] sm:$0x1] %v184_v9 }
 0x23d   :  { %209 = dma.vmem_to_hbm [thread:$0]  %s205_s29, 16, %s207_s5, [#allocation7]  }
 0x23e   :  { %348 = dma.done.wait [#allocation4], 256  }
 0x23f   :  { %349 = vsyncadd [#allocation4], 4294967040 }
 0x240   :  { %350 = dma.done.wait [#allocation7], 16  }
 0x241   :  { %351 = vsyncadd [#allocation7], 4294967280 }
 0x242   :  { %218 = vsyncpa [#allocation3], 1 }
 0x243   :  { %219 = vsyncpa [#allocation4], 1 }
 0x244   :  { %220 = vsyncpa [#allocation7], 1 }

</bundles_post_ra>
